<compile_context>
chip_gen: v5e
topology: v5e:2x2
jax: 0.10.0
libtpu: 0.0.40
codegen_flags: <defaults>
</compile_context>

<pallas_src>
import functools

import jax
import jax.numpy as jnp
from jax import lax
from jax.experimental import pallas as pl
from jax.experimental.pallas import tpu as pltpu

_LANE = 128
_MAX_BLOCK_ROWS = 4096  # (4096, 128) f32 = 2 MiB per block; 4 buffers ~ 8 MiB VMEM.


def _round_up(a: int, b: int) -> int:
    return ((a + b - 1) // b) * b


@functools.partial(jax.jit, static_argnames=("n", "max_block_rows"))
def _ema_norm_pallas(flat2d, inv_scale, *, n, max_block_rows):
    """flat2d: (rows, 128) slab of x; inv_scale: (1,) f32; n: true element count."""
    rows, lane = flat2d.shape
    itemsize = flat2d.dtype.itemsize
    sub = max(8, 32 // itemsize)                       # sublane packing: 8 f32 / 16 bf16

    br = _round_up(min(max_block_rows, rows), sub)     # block rows (multiple of sub, >= 8)
    total_blocks = pl.cdiv(rows, br)
    nc = 2 if total_blocks >= 2 else 1                 # leading "parallel" axis (2 TCs on v7x)
    steps = pl.cdiv(total_blocks, nc)
    has_dup = (nc * steps != total_blocks)             # last core may revisit the final block
    needs_mask = (total_blocks * br * lane != n)       # last block has OOB / padded elements

    def row_block(c, j):
        blk = c * steps + j
        if has_dup:
            # Duplicate trailing steps clamp onto the last real block; they rewrite identical
            # y values (benign, same core) and skip accumulation inside the kernel.
            blk = jnp.minimum(blk, total_blocks - 1)
        return (blk, 0)

    def kernel(inv_ref, x_ref, y_ref, sum_ref, sq_ref):
        c = pl.program_id(0)
        j = pl.program_id(1)
        blk = c * steps + j                            # unclamped logical block id

        # Per-core accumulator init (outputs double as resident accumulators).
        @pl.when(j == 0)
        def _init():
            sum_ref[...] = jnp.zeros_like(sum_ref)
            sq_ref[...] = jnp.zeros_like(sq_ref)

        x = x_ref[...].astype(jnp.float32)

        def accumulate(xv):
            x3 = xv.reshape(br // 8, 8, lane)          # (8,128) vreg tiles stacked on axis 0
            sum_ref[...] += jnp.sum(x3, axis=0)
            sq_ref[...] += jnp.sum(x3 * x3, axis=0)

        n_full = total_blocks - (1 if needs_mask else 0)
        if n_full > 0:
            @pl.when(blk < n_full)
            def _acc_full():
                accumulate(x)

        if needs_mask:
            @pl.when(blk == total_blocks - 1)
            def _acc_tail():
                r = lax.broadcasted_iota(jnp.int32, (br, lane), 0)
                l = lax.broadcasted_iota(jnp.int32, (br, lane), 1)
                gidx = blk * (br * lane) + r * lane + l
                accumulate(jnp.where(gidx < n, x, 0.0))

        # Elementwise normalize; OOB rows of boundary blocks are dropped on writeback.
        y_ref[...] = (x * inv_ref[0]).astype(y_ref.dtype)

    y2d, sums, sqs = pl.pallas_call(
        kernel,
        out_shape=(
            jax.ShapeDtypeStruct((rows, lane), flat2d.dtype),
            jax.ShapeDtypeStruct((nc * 8, lane), jnp.float32),
            jax.ShapeDtypeStruct((nc * 8, lane), jnp.float32),
        ),
        grid_spec=pltpu.PrefetchScalarGridSpec(
            num_scalar_prefetch=0,
            grid=(nc, steps),
            in_specs=[
                pl.BlockSpec(memory_space=pltpu.MemorySpace.SMEM),   # inv_scale (1,)
                pl.BlockSpec((br, lane), row_block),                 # x tile
            ],
            out_specs=[
                pl.BlockSpec((br, lane), row_block),                 # y tile
                pl.BlockSpec((8, lane), lambda c, j: (c, 0)),        # per-core partial sum
                pl.BlockSpec((8, lane), lambda c, j: (c, 0)),        # per-core partial sumsq
            ],
        ),
        compiler_params=pltpu.CompilerParams(
            dimension_semantics=("parallel", "arbitrary"),
            vmem_limit_bytes=32 * 1024 * 1024,
        ),
        cost_estimate=pl.CostEstimate(
            flops=4 * n,
            transcendentals=0,
            bytes_accessed=2 * n * itemsize + 2 * nc * 8 * lane * 4,
        ),
    )(inv_scale, flat2d)

    # Single tiny cross-lane/sublane reduction of the vreg-shaped partials (done in XLA).
    return y2d, jnp.sum(sums), jnp.sum(sqs)


class EMAStdNormalizer:
    """JAX/Pallas port of ssm_rl.util.normalizer.EMAStdNormalizer."""

    def __init__(self, decay: float, min_scale: float = 1.0,
                 max_block_rows: int = _MAX_BLOCK_ROWS):
        self._decay = float(decay)
        # register_buffer('_ema_std', torch.tensor(1)); the original update writes
        # `_ema_lower` and never touches `_ema_std` -- reproduced exactly.
        self._ema_std = jnp.asarray(1.0, jnp.float32)
        self._min_scale = jnp.asarray(min_scale, jnp.float32)
        self._ct = 0
        self._ema_lower = None
        self._max_block_rows = int(max_block_rows)

    def __call__(self, x: jax.Array) -> jax.Array:
        orig_shape = x.shape
        n = int(x.size)
        assert n > 0, "EMAStdNormalizer called with an empty tensor"

        # Lay x out as an (rows, 128) lane-dense slab. Common case (n % 128 == 0): pure
        # reshape, no padded copy and no output slice. Ragged case: pad to the next multiple
        # of 128; the kernel masks the padded / OOB tail using the true element count n.
        if n % _LANE == 0:
            flat2d = x.reshape(n // _LANE, _LANE)
            padded = False
        else:
            rows = pl.cdiv(n, _LANE)
            flat2d = jnp.pad(x.reshape(-1), (0, rows * _LANE - n)).reshape(rows, _LANE)
            padded = True

        # Hoisted scalar reciprocal of max(ema_std, min_scale).
        scale = jnp.maximum(self._ema_std, self._min_scale)
        inv_scale = (1.0 / scale).astype(jnp.float32).reshape(1)

        y2d, s, q = _ema_norm_pallas(
            flat2d, inv_scale, n=n, max_block_rows=self._max_block_rows)

        y = (y2d.reshape(-1)[:n].reshape(orig_shape) if padded
             else y2d.reshape(orig_shape))

        # _update_on_batch bookkeeping (torch.std default is Bessel-corrected, ddof=1).
        denom = max(n - 1, 1)
        var = jnp.maximum((q - s * s / n) / denom, 0.0)
        std = jnp.sqrt(var)
        decay = min(self._ct / (self._ct + 1), self._decay)
        self._ema_lower = decay * self._ema_std + (1.0 - decay) * std
        self._ct += 1
        # NOTE: original module never writes self._ema_std -> unchanged here too.
        return y


def _check_case(key, shape, *, min_scale=1.0, max_block_rows=_MAX_BLOCK_ROWS):
    x = jax.random.normal(key, shape, dtype=jnp.float32)
    norm = EMAStdNormalizer(decay=0.99, min_scale=min_scale,
                            max_block_rows=max_block_rows)
    y = norm(x)
    jax.block_until_ready(y)

    # Forward reference: scale = max(_ema_std=1, min_scale).
    ref_y = x / jnp.maximum(jnp.float32(1.0), jnp.float32(min_scale))
    assert y.shape == x.shape and y.dtype == x.dtype
    assert jnp.allclose(y, ref_y, atol=1e-6, rtol=1e-6)

    ref_std = jnp.std(x.reshape(-1), ddof=1)
    assert jnp.allclose(norm._ema_lower, ref_std, atol=1e-3, rtol=1e-3), (
        float(norm._ema_lower), float(ref_std))


if __name__ == "__main__":
    key = jax.random.PRNGKey(0)
    k1, k2, k3, k4 = jax.random.split(key, 4)

    # Small, exact single block, no pad / no mask, default (large) block rows.
    _check_case(k1, (2, 4, 16, 16))
    # Forced small blocks: 2-way "parallel" core split, even block count, no mask.
    _check_case(k2, (2, 4, 16, 16), max_block_rows=8, min_scale=2.5)
    # Odd block count: exercises the clamped duplicate trailing step.
    _check_case(k3, (2, 12, 128), max_block_rows=8)
    # Ragged n: pad + in-kernel tail masking path (also block overhang past `rows`).
    _check_case(k4, (5, 7, 33), max_block_rows=8)

    print("KERNEL_OK")
</pallas_src>

<mosaic_0001>
module attributes {stable_mosaic.version = 11 : i64} {
  func.func @kernel(%arg0: i32, %arg1: i32, %arg2: memref<1xf32, #tpu.memory_space<smem>>, %arg3: memref<16x128xf32, #tpu.memory_space<vmem>>, %arg4: memref<16x128xf32, #tpu.memory_space<vmem>>, %arg5: memref<8x128xf32, #tpu.memory_space<vmem>>, %arg6: memref<8x128xf32, #tpu.memory_space<vmem>>) attributes {dimension_semantics = [#tpu.dimension_semantics<parallel>, #tpu.dimension_semantics<arbitrary>], iteration_bounds = array<i64: 1, 1>, scalar_prefetch = 0 : i64, scratch_operands = 0 : i64, tpu.core_type = #tpu.core_type<tc>, window_params = [{transform_indices = @transform_0, window_bounds = array<i64: 1>}, {transform_indices = @transform_1, window_bounds = array<i64: 16, 128>}, {transform_indices = @transform_2, window_bounds = array<i64: 16, 128>}, {transform_indices = @transform_3, window_bounds = array<i64: 8, 128>}, {transform_indices = @transform_4, window_bounds = array<i64: 8, 128>}]} {
    %c1_i32 = arith.constant 1 : i32
    %0 = arith.muli %arg0, %c1_i32 : i32
    %1 = arith.addi %0, %arg1 : i32
    %c0_i32 = arith.constant 0 : i32
    %2 = arith.cmpi eq, %arg1, %c0_i32 : i32
    %3 = arith.extui %2 : i1 to i32
    %c0_i32_0 = arith.constant 0 : i32
    %4 = arith.cmpi ne, %3, %c0_i32_0 : i32
    scf.if %4 {
      %cst = arith.constant 0.000000e+00 : f32
      %13 = vector.broadcast %cst : f32 to vector<8x128xf32>
      %c0_7 = arith.constant 0 : index
      %c0_8 = arith.constant 0 : index
      %14 = vector.load %arg5[%c0_7, %c0_8] : memref<8x128xf32, #tpu.memory_space<vmem>>, vector<8x128xf32>
      tpu.vector_store %arg5[%c0_7, %c0_8], %13 {strides = array<i32>} : memref<8x128xf32, #tpu.memory_space<vmem>>, vector<8x128xf32>,
      %cst_9 = arith.constant 0.000000e+00 : f32
      %15 = vector.broadcast %cst_9 : f32 to vector<8x128xf32>
      %c0_10 = arith.constant 0 : index
      %c0_11 = arith.constant 0 : index
      %16 = vector.load %arg6[%c0_10, %c0_11] : memref<8x128xf32, #tpu.memory_space<vmem>>, vector<8x128xf32>
      tpu.vector_store %arg6[%c0_10, %c0_11], %15 {strides = array<i32>} : memref<8x128xf32, #tpu.memory_space<vmem>>, vector<8x128xf32>,
    } else {
    }
    %c0 = arith.constant 0 : index
    %c0_1 = arith.constant 0 : index
    %5 = vector.load %arg3[%c0, %c0_1] : memref<16x128xf32, #tpu.memory_space<vmem>>, vector<16x128xf32>
    %c1_i32_2 = arith.constant 1 : i32
    %6 = arith.cmpi slt, %1, %c1_i32_2 : i32
    %7 = arith.extui %6 : i1 to i32
    %c0_i32_3 = arith.constant 0 : i32
    %8 = arith.cmpi ne, %7, %c0_i32_3 : i32
    scf.if %8 {
      %13 = vector.shape_cast %5 : vector<16x128xf32> to vector<2x8x128xf32>
      %c0_7 = arith.constant 0 : index
      %c0_8 = arith.constant 0 : index
      %14 = vector.load %arg5[%c0_7, %c0_8] : memref<8x128xf32, #tpu.memory_space<vmem>>, vector<8x128xf32>
      %cst = arith.constant dense<0.000000e+00> : vector<8x128xf32>
      %15 = vector.multi_reduction <add>, %13, %cst [0] : vector<2x8x128xf32> to vector<8x128xf32>
      %16 = arith.addf %14, %15 : vector<8x128xf32>
      %c0_9 = arith.constant 0 : index
      %c0_10 = arith.constant 0 : index
      %17 = vector.load %arg5[%c0_9, %c0_10] : memref<8x128xf32, #tpu.memory_space<vmem>>, vector<8x128xf32>
      tpu.vector_store %arg5[%c0_9, %c0_10], %16 {strides = array<i32>} : memref<8x128xf32, #tpu.memory_space<vmem>>, vector<8x128xf32>,
      %c0_11 = arith.constant 0 : index
      %c0_12 = arith.constant 0 : index
      %18 = vector.load %arg6[%c0_11, %c0_12] : memref<8x128xf32, #tpu.memory_space<vmem>>, vector<8x128xf32>
      %19 = arith.mulf %13, %13 : vector<2x8x128xf32>
      %cst_13 = arith.constant dense<0.000000e+00> : vector<8x128xf32>
      %20 = vector.multi_reduction <add>, %19, %cst_13 [0] : vector<2x8x128xf32> to vector<8x128xf32>
      %21 = arith.addf %18, %20 : vector<8x128xf32>
      %c0_14 = arith.constant 0 : index
      %c0_15 = arith.constant 0 : index
      %22 = vector.load %arg6[%c0_14, %c0_15] : memref<8x128xf32, #tpu.memory_space<vmem>>, vector<8x128xf32>
      tpu.vector_store %arg6[%c0_14, %c0_15], %21 {strides = array<i32>} : memref<8x128xf32, #tpu.memory_space<vmem>>, vector<8x128xf32>,
    } else {
    }
    %c0_4 = arith.constant 0 : index
    %9 = memref.load %arg2[%c0_4] : memref<1xf32, #tpu.memory_space<smem>>
    %10 = vector.broadcast %9 : f32 to vector<16x128xf32>
    %11 = arith.mulf %5, %10 : vector<16x128xf32>
    %c0_5 = arith.constant 0 : index
    %c0_6 = arith.constant 0 : index
    %12 = vector.load %arg4[%c0_5, %c0_6] : memref<16x128xf32, #tpu.memory_space<vmem>>, vector<16x128xf32>
    tpu.vector_store %arg4[%c0_5, %c0_6], %11 {strides = array<i32>} : memref<16x128xf32, #tpu.memory_space<vmem>>, vector<16x128xf32>,
    return
  }
  func.func @transform_0(%arg0: i32, %arg1: i32) -> i32 {
    %c0_i32 = arith.constant 0 : i32
    %c0_i32_0 = arith.constant 0 : i32
    return %c0_i32 : i32
  }
  func.func @transform_1(%arg0: i32, %arg1: i32) -> (i32, i32) {
    %c1_i32 = arith.constant 1 : i32
    %0 = arith.muli %arg0, %c1_i32 : i32
    %1 = arith.addi %0, %arg1 : i32
    %c0_i32 = arith.constant 0 : i32
    %c0_i32_0 = arith.constant 0 : i32
    return %1, %c0_i32 : i32, i32
  }
  func.func @transform_2(%arg0: i32, %arg1: i32) -> (i32, i32) {
    %c1_i32 = arith.constant 1 : i32
    %0 = arith.muli %arg0, %c1_i32 : i32
    %1 = arith.addi %0, %arg1 : i32
    %c0_i32 = arith.constant 0 : i32
    %c0_i32_0 = arith.constant 0 : i32
    return %1, %c0_i32 : i32, i32
  }
  func.func @transform_3(%arg0: i32, %arg1: i32) -> (i32, i32) {
    %c0_i32 = arith.constant 0 : i32
    %c0_i32_0 = arith.constant 0 : i32
    return %arg0, %c0_i32 : i32, i32
  }
  func.func @transform_4(%arg0: i32, %arg1: i32) -> (i32, i32) {
    %c0_i32 = arith.constant 0 : i32
    %c0_i32_0 = arith.constant 0 : i32
    return %arg0, %c0_i32 : i32, i32
  }
}

</mosaic_0001>

<bundles_post_ra>
// kernel: _ema_norm_pallas.1
= control target key start
LH: loop header
LB: loop body
LE: loop exit
PB: predicated region body
PF: predicated region fallthrough
CT: control target
= control target key end

     0   :  { %11 = vsyncpa [#allocation4], 0  ;;  %s201_s0 = inlined_call_operand.<no memory space> [shape: f32[1], index: 0, kind: input, shape index: {}]   ;;  %s202_s1 = inlined_call_operand.hbm [shape: f32[16,128], index: 1, kind: input, shape index: {}]   ;;  %s203_s2 = inlined_call_operand.hbm [shape: f32[16,128], index: 2, kind: output, shape index: {0}]   ;;  %s204_s3 = inlined_call_operand.vmem [shape: f32[8,128], index: 3, kind: output, shape index: {1}]   ;;  %s205_s4 = inlined_call_operand.vmem [shape: f32[8,128], index: 4, kind: output, shape index: {2}]  }
   0x1   :  { %12 = vsyncpa [#allocation5], 0  ;;  %s23_s17 = sshll.u32 %s202_s1, 4  ;;  %s157_s18 = smov [#allocation3]   ;;  %s24_s17 = int_to_ptr.hbm [resolvable:$true] %s23_s17 }
   0x2   :  { %s25_s19 = sshll.u32 %s157_s18, 4  ;;  %s158_s20 = smov 128   ;;  %s26_s19 = int_to_ptr.vmem [resolvable:$true] %s25_s19 }
   0x3   :  { %s159_s21 = smov 8  }
   0x4   :  { %31 = dma.hbm_to_vmem [thread:$0]  %s24_s17, 256, %s26_s19, [#allocation4], %s158_s20, %s158_s20, %s159_s21  }
   0x5   :  { %153 = dma.done.wait [#allocation4], 256  }
   0x6   :  { %154 = vsyncadd [#allocation4], 4294967040  ;;  %v64_v0 = vstv %s201_s0  ;;  %v47_v1 = vld [vmem:[#allocation3] sm:$0xff]  ;;  %v48_v2 = vld [vmem:[#allocation3 + $0x8] sm:$0xff]  ;;  %s160_s24 = smov [#allocation6]   ;;  %s79_s1 = sshll.u32 %s203_s2, 4  ;;  %s80_s1 = int_to_ptr.hbm [resolvable:$true] %s79_s1 }
   0x7   :  { %s77_s25 = sshll.u32 %s160_s24, 4  ;;  %v58_v3 = vmul.f32 %v47_v1, %v47_v1  ;;  %v65_v4 = vmul.f32 %v64_v0, %v47_v1  ;;  %v54_v5 = vadd.f32 %v48_v2, %v47_v1  ;;  %v59_v6 = vmul.f32 %v48_v2, %v48_v2  ;;  %s78_s25 = int_to_ptr.vmem [resolvable:$true] %s77_s25 }
   0x8   :  { %v66_v7 = vmul.f32 %v64_v0, %v48_v2 }
   0x9   :  { %67 = vst [vmem:[#allocation6] sm:$0xff] %v65_v4  ;;  %v60_v8 = vadd.f32 %v59_v6, %v58_v3 }
   0xa   :  { %68 = vst [vmem:[#allocation6 + $0x8] sm:$0xff] %v66_v7 }
   0xb   :  { %56 = vst [vmem:[%s204_s3] sm:$0xff] %v54_v5 }
   0xc   :  { %85 = dma.vmem_to_hbm [thread:$0]  %s78_s25, 256, %s80_s1, [#allocation5], %s158_s20, %s158_s20, %s159_s21  }
   0xd   :  { %62 = vst [vmem:[%s205_s4] sm:$0xff] %v60_v8 }
   0xe   :  { %155 = dma.done.wait [#allocation5], 256  }
   0xf   :  { %156 = vsyncadd [#allocation5], 4294967040 }
  0x10   :  { %98 = vsyncpa [#allocation4], 1 }
  0x11   :  { %99 = vsyncpa [#allocation5], 1 }

</bundles_post_ra>
